<compile_context>
chip_gen: v7x
topology: tpu7x:2x2x1
jax: 0.10.0
libtpu: 0.0.40
codegen_flags: <defaults>
</compile_context>

<pallas_src>
import jax
import jax.numpy as jnp
from jax.experimental import pallas as pl
from jax.experimental.pallas import tpu as pltpu


_LANE = 128      # TPU lane width  (last-dim unit)
_SUBLANE = 8     # TPU sublane width (second-to-last-dim unit)


def _cdiv(a, b):
    return -(-a // b)


def _round_up(x, m):
    return _cdiv(x, m) * m


def decoder_kernel(x_ref, w1_ref, b1_ref, w2_ref, b2_ref, w3_ref, b3_ref, o_ref):
    """Fused 3-layer MLP on one batch tile.

    Matmul operands use the weights' dtype (bf16 recommended on all chips);
    accumulation, bias add, ReLU and sigmoid are f32.  x is cast in-kernel.
    """
    cdt = w1_ref.dtype                           # compute (MXU operand) dtype
    x = x_ref[...].astype(cdt)                   # in-kernel cast: no extra HBM pass

    h1 = jnp.dot(x, w1_ref[...], preferred_element_type=jnp.float32)
    h1 = jnp.maximum(h1 + b1_ref[...], 0.0).astype(cdt)        # f32 epilogue -> cdt

    h2 = jnp.dot(h1, w2_ref[...], preferred_element_type=jnp.float32)
    h2 = jnp.maximum(h2 + b2_ref[...], 0.0).astype(cdt)        # f32 epilogue -> cdt

    logits = jnp.dot(h2, w3_ref[...], preferred_element_type=jnp.float32)
    logits = logits + b3_ref[...]

    o_ref[...] = jax.nn.sigmoid(logits).astype(o_ref.dtype)    # f32 sigmoid (EUP)


def prepare_params(params, compute_dtype=jnp.bfloat16):
    """One-time parameter prep (hoisted out of the forward path).

    Casts weights to the matmul operand dtype, keeps biases f32, and reshapes
    1-D (fan_out,) biases defensively to (1, fan_out).
    """
    def _bias(b):
        b = jnp.asarray(b, jnp.float32)
        return b.reshape(1, -1) if b.ndim == 1 else b

    return {
        "w1": jnp.asarray(params["w1"], compute_dtype),
        "b1": _bias(params["b1"]),
        "w2": jnp.asarray(params["w2"], compute_dtype),
        "b2": _bias(params["b2"]),
        "w3": jnp.asarray(params["w3"], compute_dtype),
        "b3": _bias(params["b3"]),
    }


def decoder_forward(x, prepared, *, batch_tile=1024):
    """x: (B, latent_dim) f32.  prepared: output of prepare_params()."""
    B, latent_dim = x.shape
    w1, b1 = prepared["w1"], prepared["b1"]
    w2, b2 = prepared["w2"], prepared["b2"]
    w3, b3 = prepared["w3"], prepared["b3"]
    h1_dim = w1.shape[1]          # 256
    h2_dim = w2.shape[1]          # 512
    out_dim = w3.shape[1]

    # ---- batch tiling --------------------------------------------------
    tile = max(_SUBLANE, min(int(batch_tile), _round_up(B, _SUBLANE)))
    tile = _round_up(tile, _SUBLANE)
    if B >= 2 * _LANE:
        # Guarantee >=2 grid steps for large batches so the "parallel" axis
        # can shard across the two TensorCores on v7x.
        tile = min(tile, _round_up(_cdiv(B, 2), _SUBLANE))
    n_steps = _cdiv(B, tile)
    tile = _round_up(_cdiv(B, n_steps), _SUBLANE)    # rebalance -> minimal padding
    b_pad = tile * n_steps

    # Pad the batch only when actually needed (x stays in its input dtype).
    xp = x if b_pad == B else jnp.pad(x, ((0, b_pad - B), (0, 0)))

    # Weights / biases: full-array blocks with constant index_map -> DMA'd once,
    # VMEM-resident across the whole batch grid (~0.7 MiB total in bf16).
    full = lambda shape: pl.BlockSpec(shape, lambda i: (0,) * len(shape))

    w_bytes = sum(int(a.size) * a.dtype.itemsize for a in (w1, b1, w2, b2, w3, b3))
    cost = pl.CostEstimate(
        flops=2 * b_pad * (latent_dim * h1_dim + h1_dim * h2_dim + h2_dim * out_dim),
        transcendentals=b_pad * out_dim,                        # sigmoid
        bytes_accessed=(b_pad * latent_dim * x.dtype.itemsize   # x read
                        + w_bytes                               # params read
                        + b_pad * out_dim * 4),                 # f32 output write
    )

    out = pl.pallas_call(
        decoder_kernel,
        out_shape=jax.ShapeDtypeStruct((b_pad, out_dim), jnp.float32),
        grid_spec=pltpu.PrefetchScalarGridSpec(
            num_scalar_prefetch=0,
            grid=(n_steps,),
            in_specs=[
                pl.BlockSpec((tile, latent_dim), lambda i: (i, 0)),  # x tile
                full((latent_dim, h1_dim)),
                full((1, h1_dim)),
                full((h1_dim, h2_dim)),
                full((1, h2_dim)),
                full((h2_dim, out_dim)),
                full((1, out_dim)),
            ],
            # Output block last dim == full array dim -> allowed by the (8,128)
            # rule; no lane padding / post-slice, so no extra output traffic.
            out_specs=pl.BlockSpec((tile, out_dim), lambda i: (i, 0)),
        ),
        compiler_params=pltpu.CompilerParams(
            dimension_semantics=("parallel",),
            # VMEM at tile=1024: ~3 MiB of intermediates + <1 MiB weights +
            # double-buffered x/out -- well under the 32 MiB scoped default on
            # every chip (incl. v7x).  Set vmem_limit_bytes only if the tile
            # is grown far past ~2048 rows.
        ),
        cost_estimate=cost,
    )(xp, w1, b1, w2, b2, w3, b3)

    # Strip batch padding only if any was added.
    return out if b_pad == B else out[:B]


def init_params(key, latent_dim, output_dim):
    """Deterministic synthetic init (PyTorch-like uniform fan-in scaling)."""
    dims = [(latent_dim, 256), (256, 512), (512, output_dim)]
    params = {}
    for idx, (fan_in, fan_out) in enumerate(dims, start=1):
        key, kw, kb = jax.random.split(key, 3)
        bound = 1.0 / jnp.sqrt(fan_in)
        params[f"w{idx}"] = jax.random.uniform(
            kw, (fan_in, fan_out), jnp.float32, -bound, bound)
        params[f"b{idx}"] = jax.random.uniform(
            kb, (1, fan_out), jnp.float32, -bound, bound)
    return params


def reference_forward(x, params):
    h1 = jnp.maximum(x @ params["w1"] + params["b1"], 0.0)
    h2 = jnp.maximum(h1 @ params["w2"] + params["b2"], 0.0)
    return jax.nn.sigmoid(h2 @ params["w3"] + params["b3"])


if __name__ == "__main__":
    latent_dim = 16
    output_dim = 64
    batch = 12            # deliberately NOT a multiple of 8 -> exercises padding path

    key = jax.random.PRNGKey(0)
    key, kx = jax.random.split(key)
    x = jax.random.normal(kx, (batch, latent_dim), dtype=jnp.float32)
    params = init_params(key, latent_dim, output_dim)

    ref = reference_forward(x, params)

    # f32 operand path: exact parity with the reference.
    out_f32 = jax.block_until_ready(
        decoder_forward(x, prepare_params(params, jnp.float32)))
    assert out_f32.shape == (batch, output_dim)
    assert jnp.allclose(out_f32, ref, atol=1e-5, rtol=1e-5), "f32 mismatch vs reference"

    # bf16 operand path (recommended default on v5e/v6e/v7x): f32 accumulation,
    # looser tolerance against the f32 reference is expected.
    out_bf16 = jax.block_until_ready(
        decoder_forward(x, prepare_params(params, jnp.bfloat16)))
    assert out_bf16.shape == (batch, output_dim)
    assert jnp.allclose(out_bf16, ref, atol=5e-2, rtol=5e-2), "bf16 mismatch vs reference"

    print("KERNEL_OK")
</pallas_src>

<mosaic_0001>
module attributes {stable_mosaic.version = 11 : i64} {
  func.func @decoder_kernel(%arg0: i32, %arg1: memref<16x16xf32, #tpu.memory_space<vmem>>, %arg2: memref<16x256xf32, #tpu.memory_space<vmem>>, %arg3: memref<1x256xf32, #tpu.memory_space<vmem>>, %arg4: memref<256x512xf32, #tpu.memory_space<vmem>>, %arg5: memref<1x512xf32, #tpu.memory_space<vmem>>, %arg6: memref<512x64xf32, #tpu.memory_space<vmem>>, %arg7: memref<1x64xf32, #tpu.memory_space<vmem>>, %arg8: memref<16x64xf32, #tpu.memory_space<vmem>>) attributes {dimension_semantics = [#tpu.dimension_semantics<parallel>], iteration_bounds = array<i64: 1>, scalar_prefetch = 0 : i64, scratch_operands = 0 : i64, tpu.core_type = #tpu.core_type<tc>, window_params = [{transform_indices = @transform_0, window_bounds = array<i64: 16, 16>}, {pipeline_mode = #tpu.pipeline_mode<synchronous>, transform_indices = @transform_1, window_bounds = array<i64: 16, 256>}, {pipeline_mode = #tpu.pipeline_mode<synchronous>, transform_indices = @transform_2, window_bounds = array<i64: 1, 256>}, {pipeline_mode = #tpu.pipeline_mode<synchronous>, transform_indices = @transform_3, window_bounds = array<i64: 256, 512>}, {pipeline_mode = #tpu.pipeline_mode<synchronous>, transform_indices = @transform_4, window_bounds = array<i64: 1, 512>}, {pipeline_mode = #tpu.pipeline_mode<synchronous>, transform_indices = @transform_5, window_bounds = array<i64: 512, 64>}, {pipeline_mode = #tpu.pipeline_mode<synchronous>, transform_indices = @transform_6, window_bounds = array<i64: 1, 64>}, {transform_indices = @transform_7, window_bounds = array<i64: 16, 64>}]} {
    %c0 = arith.constant 0 : index
    %c0_0 = arith.constant 0 : index
    %0 = vector.load %arg1[%c0, %c0_0] : memref<16x16xf32, #tpu.memory_space<vmem>>, vector<16x16xf32>
    %c0_1 = arith.constant 0 : index
    %c0_2 = arith.constant 0 : index
    %1 = vector.load %arg2[%c0_1, %c0_2] : memref<16x256xf32, #tpu.memory_space<vmem>>, vector<16x256xf32>
    %cst = arith.constant dense<0.000000e+00> : vector<16x256xf32>
    %2 = tpu.matmul %0, %1, %cst {dimension_numbers = #tpu.dot_dimension_numbers<[1], [0], [0], [1], [0, 0, 1, 1], [], []>} : vector<16x16xf32>, vector<16x256xf32>, vector<16x256xf32> -> vector<16x256xf32>
    %c0_3 = arith.constant 0 : index
    %c0_4 = arith.constant 0 : index
    %3 = vector.load %arg3[%c0_3, %c0_4] : memref<1x256xf32, #tpu.memory_space<vmem>>, vector<1x256xf32>
    %4 = vector.broadcast %3 : vector<1x256xf32> to vector<16x256xf32>
    %5 = arith.addf %2, %4 : vector<16x256xf32>
    %cst_5 = arith.constant 0.000000e+00 : f32
    %6 = vector.broadcast %cst_5 : f32 to vector<16x256xf32>
    %7 = arith.maximumf %5, %6 : vector<16x256xf32>
    %c0_6 = arith.constant 0 : index
    %c0_7 = arith.constant 0 : index
    %8 = vector.load %arg4[%c0_6, %c0_7] : memref<256x512xf32, #tpu.memory_space<vmem>>, vector<256x512xf32>
    %cst_8 = arith.constant dense<0.000000e+00> : vector<16x512xf32>
    %9 = tpu.matmul %7, %8, %cst_8 {dimension_numbers = #tpu.dot_dimension_numbers<[1], [0], [0], [1], [0, 0, 1, 1], [], []>} : vector<16x256xf32>, vector<256x512xf32>, vector<16x512xf32> -> vector<16x512xf32>
    %c0_9 = arith.constant 0 : index
    %c0_10 = arith.constant 0 : index
    %10 = vector.load %arg5[%c0_9, %c0_10] : memref<1x512xf32, #tpu.memory_space<vmem>>, vector<1x512xf32>
    %11 = vector.broadcast %10 : vector<1x512xf32> to vector<16x512xf32>
    %12 = arith.addf %9, %11 : vector<16x512xf32>
    %cst_11 = arith.constant 0.000000e+00 : f32
    %13 = vector.broadcast %cst_11 : f32 to vector<16x512xf32>
    %14 = arith.maximumf %12, %13 : vector<16x512xf32>
    %c0_12 = arith.constant 0 : index
    %c0_13 = arith.constant 0 : index
    %15 = vector.load %arg6[%c0_12, %c0_13] : memref<512x64xf32, #tpu.memory_space<vmem>>, vector<512x64xf32>
    %cst_14 = arith.constant dense<0.000000e+00> : vector<16x64xf32>
    %16 = tpu.matmul %14, %15, %cst_14 {dimension_numbers = #tpu.dot_dimension_numbers<[1], [0], [0], [1], [0, 0, 1, 1], [], []>} : vector<16x512xf32>, vector<512x64xf32>, vector<16x64xf32> -> vector<16x64xf32>
    %c0_15 = arith.constant 0 : index
    %c0_16 = arith.constant 0 : index
    %17 = vector.load %arg7[%c0_15, %c0_16] : memref<1x64xf32, #tpu.memory_space<vmem>>, vector<1x64xf32>
    %18 = vector.broadcast %17 : vector<1x64xf32> to vector<16x64xf32>
    %19 = arith.addf %16, %18 : vector<16x64xf32>
    %20 = arith.negf %19 : vector<16x64xf32>
    %21 = math.exp %20 : vector<16x64xf32>
    %cst_17 = arith.constant 1.000000e+00 : f32
    %22 = vector.broadcast %cst_17 : f32 to vector<16x64xf32>
    %23 = arith.addf %22, %21 : vector<16x64xf32>
    %24 = arith.divf %22, %23 : vector<16x64xf32>
    %c0_18 = arith.constant 0 : index
    %c0_19 = arith.constant 0 : index
    %25 = vector.load %arg8[%c0_18, %c0_19] : memref<16x64xf32, #tpu.memory_space<vmem>>, vector<16x64xf32>
    tpu.vector_store %arg8[%c0_18, %c0_19], %24 {strides = array<i32>} : memref<16x64xf32, #tpu.memory_space<vmem>>, vector<16x64xf32>,
    return
  }
  func.func @transform_0(%arg0: i32) -> (i32, i32) {
    %c0_i32 = arith.constant 0 : i32
    %c0_i32_0 = arith.constant 0 : i32
    return %arg0, %c0_i32 : i32, i32
  }
  func.func @transform_1(%arg0: i32) -> (i32, i32) {
    %c0_i32 = arith.constant 0 : i32
    %c0_i32_0 = arith.constant 0 : i32
    %c0_i32_1 = arith.constant 0 : i32
    return %c0_i32, %c0_i32_0 : i32, i32
  }
  func.func @transform_2(%arg0: i32) -> (i32, i32) {
    %c0_i32 = arith.constant 0 : i32
    %c0_i32_0 = arith.constant 0 : i32
    %c0_i32_1 = arith.constant 0 : i32
    return %c0_i32, %c0_i32_0 : i32, i32
  }
  func.func @transform_3(%arg0: i32) -> (i32, i32) {
    %c0_i32 = arith.constant 0 : i32
    %c0_i32_0 = arith.constant 0 : i32
    %c0_i32_1 = arith.constant 0 : i32
    return %c0_i32, %c0_i32_0 : i32, i32
  }
  func.func @transform_4(%arg0: i32) -> (i32, i32) {
    %c0_i32 = arith.constant 0 : i32
    %c0_i32_0 = arith.constant 0 : i32
    %c0_i32_1 = arith.constant 0 : i32
    return %c0_i32, %c0_i32_0 : i32, i32
  }
  func.func @transform_5(%arg0: i32) -> (i32, i32) {
    %c0_i32 = arith.constant 0 : i32
    %c0_i32_0 = arith.constant 0 : i32
    %c0_i32_1 = arith.constant 0 : i32
    return %c0_i32, %c0_i32_0 : i32, i32
  }
  func.func @transform_6(%arg0: i32) -> (i32, i32) {
    %c0_i32 = arith.constant 0 : i32
    %c0_i32_0 = arith.constant 0 : i32
    %c0_i32_1 = arith.constant 0 : i32
    return %c0_i32, %c0_i32_0 : i32, i32
  }
  func.func @transform_7(%arg0: i32) -> (i32, i32) {
    %c0_i32 = arith.constant 0 : i32
    %c0_i32_0 = arith.constant 0 : i32
    return %arg0, %c0_i32 : i32, i32
  }
}

</mosaic_0001>

<bundles_post_ra>
// kernel: tpu_custom_call.1
= control target key start
LH: loop header
LB: loop body
LE: loop exit
PB: predicated region body
PF: predicated region fallthrough
CT: control target
= control target key end

     0   :  { %12 = vsyncpa [#allocation3], 0  ;;  %s1358_s0 = inlined_call_operand.vmem [shape: f32[16,16], index: 0, kind: input, shape index: {}]   ;;  %s1359_s1 = inlined_call_operand.vmem [shape: f32[16,256], index: 1, kind: input, shape index: {}]   ;;  %s1360_s2 = inlined_call_operand.vmem [shape: f32[1,256], index: 2, kind: input, shape index: {}]   ;;  %s1361_s3 = inlined_call_operand.hbm [shape: f32[256,512], index: 3, kind: input, shape index: {}]   ;;  %s1362_s4 = inlined_call_operand.vmem [shape: f32[1,512], index: 4, kind: input, shape index: {}]   ;;  %s1363_s5 = inlined_call_operand.vmem [shape: f32[512,64], index: 5, kind: input, shape index: {}]   ;;  %s1364_s6 = inlined_call_operand.vmem [shape: f32[1,64], index: 6, kind: input, shape index: {}]   ;;  %s1365_s7 = inlined_call_operand.hbm [shape: f32[16,64], index: 7, kind: output, shape index: {}]  }
   0x1   :  { %13 = vsyncpa [#allocation4], 0  ;;  %s1052_s24 = smov [#allocation2]   ;;  %s1004_s28 = scalar_lea.hbm %s1361_s3, 16384 }
   0x2   :  { %s25_s25 = sshll.u32 %s1052_s24, 4  ;;  %p1005_p0 = scmp.ne.s32.totalorder %s1361_s3, %s1004_s28  ;;  %s26_s25 = int_to_ptr.vmem [resolvable:$true] %s25_s25 }
   0x3   :  { %p1008_p1 = scmp.lt.u32.totalorder %s1004_s28, %s1361_s3 }
   0x5   :  { %p1010_p2 = pnand %p1008_p1, %p1005_p0 }
   0x7   :  { %1013 = shalt.err (!%p1010_p2)
}
   0x8   :  { %s1014_s10 = scalar_lea.vmem %s26_s25, 16384  ;;  %p1019_p4 = scmp.lt.s32.totalorder %s26_s25, %s26_s25 }
   0x9   :  { %p1015_p3 = scmp.ne.s32.totalorder %s26_s25, %s1014_s10  ;;  %p1020_p5 = scmp.lt.s32.totalorder %s1014_s10, %s1014_s10 }
   0xb   :  { %p1021_p6 = por %p1020_p5, %p1019_p4 }
   0xd   :  { %p1022_p7 = pnand %p1021_p6, %p1015_p3 }
   0xf   :  { %1025 = shalt.err (!%p1022_p7)
}
  0x10   :  { %s1053_s11 = smov 512   ;;  %s1054_s12 = smov 32  }
  0x11   :  { %31 = dma.hbm_to_vmem [thread:$0]  %s1361_s3, 16384, %s26_s25, [#allocation3], %s1053_s11, %s1053_s11, %s1054_s12  }
  0x12   :  { %1048 = dma.done.wait [#allocation3], 16384  }
  0x13   :  { %1049 = vsyncadd [#allocation3], 4294950912  ;;  %v1055_v0 = vmov 0.0   ;;  %v44_v1 = vld [vmem:[%s1359_s1 + $0x8] sm:$0xff]  ;;  %v46_v2 = vld [vmem:[%s1359_s1 + $0x18] sm:$0xff]  ;;  %vm59_vm0 = vcmask 130048  }
  0x14   :  { %130 = vmatprep.mubr.f32.mxu0 %v1055_v0  ;;  %v43_v3 = vld [vmem:[%s1359_s1] sm:$0xff]  ;;  %v793_v4 = vpack.c.bf16 %v46_v2, %v44_v1  ;;  %v45_v5 = vld [vmem:[%s1359_s1 + $0x10] sm:$0xff]  ;;  %v148_v8 = vld [vmem:[#allocation2 + $0x8] sm:$0xff]  ;;  %vm692_vm1 = vcmask 523264  }
  0x15   :  { %v795_v6 = vpack.c.bf16 %v45_v5, %v43_v3  ;;  %v41_v7 = vld [vmem:[%s1358_s0] sm:$0xff]  ;;  %v152_v9 = vld [vmem:[#allocation2 + $0x28] sm:$0xff]  ;;  %v150_v10 = vld [vmem:[#allocation2 + $0x18] sm:$0xff] }
  0x16   :  { %794 = vmatprep.subr.bf16.mxu0 %v793_v4  ;;  %v797_v11 = vpack.c.bf16 %v152_v9, %v148_v8  ;;  %v154_v12 = vld [vmem:[#allocation2 + $0x38] sm:$0xff]  ;;  %v147_v13 = vld [vmem:[#allocation2] sm:$0xff]  ;;  %v149_v17 = vld [vmem:[#allocation2 + $0x10] sm:$0xff] }
  0x17   :  { %v151_v14 = vld [vmem:[#allocation2 + $0x20] sm:$0xff]  ;;  %796 = vmatpush1.bf16.msra.mxu0 %v795_v6  ;;  %v861_v15 = vpack.c.bf16 %v154_v12, %v150_v10  ;;  %v153_v18 = vld [vmem:[#allocation2 + $0x30] sm:$0xff]  ;;  %v156_v19 = vld [vmem:[#allocation2 + $0x48] sm:$0xff] }
  0x18   :  { %v799_v16 = vpack.c.bf16 %v151_v14, %v147_v13  ;;  %798 = vmatprep.subr.bf16.mxu1 %v797_v11  ;;  %v863_v20 = vpack.c.bf16 %v153_v18, %v149_v17  ;;  %v160_v21 = vld [vmem:[#allocation2 + $0x68] sm:$0xff]  ;;  %v158_v22 = vld [vmem:[#allocation2 + $0x58] sm:$0xff]  ;;  %v155_v27 = vld [vmem:[#allocation2 + $0x40] sm:$0xff] }
  0x19   :  { %v162_v23 = vld [vmem:[#allocation2 + $0x78] sm:$0xff]  ;;  %v42_v24 = vld [vmem:[%s1358_s0 + $0x8] sm:$0xff]  ;;  %862 = vmatprep.subr.bf16.mxu0 %v861_v15  ;;  %v801_v25 = vpack.c.bf16 %v160_v21, %v156_v19  ;;  %v159_v28 = vld [vmem:[#allocation2 + $0x60] sm:$0xff] }
  0x1a   :  { %800 = vmatpush1.bf16.msra.mxu1 %v799_v16  ;;  %v865_v26 = vpack.c.bf16 %v162_v23, %v158_v22  ;;  %v157_v29 = vld [vmem:[#allocation2 + $0x50] sm:$0xff]  ;;  %712 = vmatmul.mubr.msk.f32.vlgmr.msra.gmra.mrb[0].mxu0 %vm59_vm0, %v41_v7  ;;  %v803_v30 = vpack.c.bf16 %v159_v28, %v155_v27  ;;  %v164_v32 = vld [vmem:[#allocation2 + $0x88] sm:$0xff]  ;;  %v166_v36 = vld [vmem:[#allocation2 + $0x98] sm:$0xff] }
  0x1b   :  { %v161_v31 = vld [vmem:[#allocation2 + $0x70] sm:$0xff]  ;;  %v168_v33 = vld [vmem:[#allocation2 + $0xa8] sm:$0xff]  ;;  %136 = vmatprep.mubr.f32.mxu0 %v1055_v0  ;;  %864 = vmatpush1.bf16.msra.mxu0 %v863_v20  ;;  %v170_v37 = vld [vmem:[#allocation2 + $0xb8] sm:$0xff] }
  0x1c   :  { %v867_v34 = vpack.c.bf16 %v161_v31, %v157_v29  ;;  %v805_v35 = vpack.c.bf16 %v168_v33, %v164_v32  ;;  %v163_v38 = vld [vmem:[#allocation2 + $0x80] sm:$0xff]  ;;  %802 = vmatprep.subr.bf16.mxu1 %v801_v25  ;;  %866 = vmatprep.subr.bf16.mxu0 %v865_v26  ;;  %v869_v39 = vpack.c.bf16 %v170_v37, %v166_v36  ;;  %v165_v41 = vld [vmem:[#allocation2 + $0x90] sm:$0xff]  ;;  %v172_v44 = vld [vmem:[#allocation2 + $0xc8] sm:$0xff] }
  0x1d   :  { %v167_v40 = vld [vmem:[#allocation2 + $0xa0] sm:$0xff]  ;;  %v169_v42 = vld [vmem:[#allocation2 + $0xb0] sm:$0xff]  ;;  %v176_v45 = vld [vmem:[#allocation2 + $0xe8] sm:$0xff] }
  0x1e   :  { %804 = vmatpush1.bf16.msra.mxu1 %v803_v30  ;;  %v807_v43 = vpack.c.bf16 %v167_v40, %v163_v38  ;;  %v174_v46 = vld [vmem:[#allocation2 + $0xd8] sm:$0xff]  ;;  %713 = vmatmul.mubr.msk.f32.gmra.mrb[2].mxu0 %vm59_vm0, %v42_v24  ;;  %v809_v47 = vpack.c.bf16 %v176_v45, %v172_v44  ;;  %v171_v49 = vld [vmem:[#allocation2 + $0xc0] sm:$0xff]  ;;  %v871_v51 = vpack.c.bf16 %v169_v42, %v165_v41  ;;  %v180_v52 = vld [vmem:[#allocation2 + $0x108] sm:$0xff] }
  0x1f   :  { %806 = vmatprep.subr.bf16.mxu1 %v805_v35  ;;  %v178_v48 = vld [vmem:[#allocation2 + $0xf8] sm:$0xff]  ;;  %v175_v50 = vld [vmem:[#allocation2 + $0xe0] sm:$0xff]  ;;  %868 = vmatpush1.bf16.msra.mxu0 %v867_v34  ;;  %v173_v54 = vld [vmem:[#allocation2 + $0xd0] sm:$0xff] }
  0x20   :  { %870 = vmatprep.subr.bf16.mxu0 %v869_v39  ;;  %v873_v53 = vpack.c.bf16 %v178_v48, %v174_v46  ;;  %v177_v55 = vld [vmem:[#allocation2 + $0xf0] sm:$0xff]  ;;  %v184_v56 = vld [vmem:[#allocation2 + $0x128] sm:$0xff]  ;;  %v811_v57 = vpack.c.bf16 %v175_v50, %v171_v49  ;;  %v182_v58 = vld [vmem:[#allocation2 + $0x118] sm:$0xff] }
  0x21   :  { %v186_v59 = vld [vmem:[#allocation2 + $0x138] sm:$0xff]  ;;  %v813_v60 = vpack.c.bf16 %v184_v56, %v180_v52  ;;  %v179_v61 = vld [vmem:[#allocation2 + $0x100] sm:$0xff]  ;;  %v875_v63 = vpack.c.bf16 %v177_v55, %v173_v54  ;;  %v188_v0 = vld [vmem:[#allocation2 + $0x148] sm:$0xff] }
  0x22   :  { %808 = vmatpush1.bf16.msra.mxu1 %v807_v43  ;;  %v183_v62 = vld [vmem:[#allocation2 + $0x120] sm:$0xff]  ;;  %v192_v1 = vld [vmem:[#allocation2 + $0x168] sm:$0xff]  ;;  %v877_v2 = vpack.c.bf16 %v186_v59, %v182_v58  ;;  %v181_v3 = vld [vmem:[#allocation2 + $0x110] sm:$0xff] }
  0x23   :  { %810 = vmatprep.subr.bf16.mxu1 %v809_v47  ;;  %872 = vmatpush1.bf16.msra.mxu0 %v871_v51  ;;  %v185_v4 = vld [vmem:[#allocation2 + $0x130] sm:$0xff]  ;;  %v815_v5 = vpack.c.bf16 %v183_v62, %v179_v61  ;;  %v190_v6 = vld [vmem:[#allocation2 + $0x158] sm:$0xff]  ;;  %v817_v8 = vpack.c.bf16 %v192_v1, %v188_v0  ;;  %v187_v9 = vld [vmem:[#allocation2 + $0x140] sm:$0xff] }
  0x24   :  { %874 = vmatprep.subr.bf16.mxu0 %v873_v53  ;;  %v194_v7 = vld [vmem:[#allocation2 + $0x178] sm:$0xff]  ;;  %v191_v10 = vld [vmem:[#allocation2 + $0x160] sm:$0xff]  ;;  %v879_v11 = vpack.c.bf16 %v185_v4, %v181_v3  ;;  %v196_v12 = vld [vmem:[#allocation2 + $0x188] sm:$0xff] }
  0x25   :  { %v200_v13 = vld [vmem:[#allocation2 + $0x1a8] sm:$0xff]  ;;  %v881_v14 = vpack.c.bf16 %v194_v7, %v190_v6  ;;  %v189_v15 = vld [vmem:[#allocation2 + $0x150] sm:$0xff]  ;;  %v819_v17 = vpack.c.bf16 %v191_v10, %v187_v9  ;;  %v198_v18 = vld [vmem:[#allocation2 + $0x198] sm:$0xff] }
  0x26   :  { %812 = vmatpush1.bf16.msra.mxu1 %v811_v57  ;;  %v193_v16 = vld [vmem:[#allocation2 + $0x170] sm:$0xff]  ;;  %v202_v19 = vld [vmem:[#allocation2 + $0x1b8] sm:$0xff]  ;;  %v821_v20 = vpack.c.bf16 %v200_v13, %v196_v12  ;;  %v195_v21 = vld [vmem:[#allocation2 + $0x180] sm:$0xff] }
  0x27   :  { %814 = vmatprep.subr.bf16.mxu1 %v813_v60  ;;  %876 = vmatpush1.bf16.msra.mxu0 %v875_v63  ;;  %v199_v22 = vld [vmem:[#allocation2 + $0x1a0] sm:$0xff]  ;;  %v883_v23 = vpack.c.bf16 %v193_v16, %v189_v15  ;;  %v204_v24 = vld [vmem:[#allocation2 + $0x1c8] sm:$0xff]  ;;  %v885_v26 = vpack.c.bf16 %v202_v19, %v198_v18  ;;  %v197_v27 = vld [vmem:[#allocation2 + $0x190] sm:$0xff] }
  0x28   :  { %878 = vmatprep.subr.bf16.mxu0 %v877_v2  ;;  %v208_v25 = vld [vmem:[#allocation2 + $0x1e8] sm:$0xff]  ;;  %v201_v28 = vld [vmem:[#allocation2 + $0x1b0] sm:$0xff]  ;;  %v823_v29 = vpack.c.bf16 %v199_v22, %v195_v21  ;;  %v206_v30 = vld [vmem:[#allocation2 + $0x1d8] sm:$0xff] }
  0x29   :  { %v210_v31 = vld [vmem:[#allocation2 + $0x1f8] sm:$0xff]  ;;  %v825_v32 = vpack.c.bf16 %v208_v25, %v204_v24  ;;  %v203_v33 = vld [vmem:[#allocation2 + $0x1c0] sm:$0xff]  ;;  %v887_v35 = vpack.c.bf16 %v201_v28, %v197_v27  ;;  %v212_v36 = vld [vmem:[#allocation2 + $0x208] sm:$0xff] }
  0x2a   :  { %816 = vmatpush1.bf16.msra.mxu1 %v815_v5  ;;  %v207_v34 = vld [vmem:[#allocation2 + $0x1e0] sm:$0xff]  ;;  %v216_v37 = vld [vmem:[#allocation2 + $0x228] sm:$0xff]  ;;  %v889_v38 = vpack.c.bf16 %v210_v31, %v206_v30  ;;  %v205_v39 = vld [vmem:[#allocation2 + $0x1d0] sm:$0xff] }
  0x2b   :  { %818 = vmatprep.subr.bf16.mxu1 %v817_v8  ;;  %880 = vmatpush1.bf16.msra.mxu0 %v879_v11  ;;  %v209_v40 = vld [vmem:[#allocation2 + $0x1f0] sm:$0xff]  ;;  %v827_v41 = vpack.c.bf16 %v207_v34, %v203_v33  ;;  %v214_v42 = vld [vmem:[#allocation2 + $0x218] sm:$0xff]  ;;  %v829_v44 = vpack.c.bf16 %v216_v37, %v212_v36  ;;  %v211_v45 = vld [vmem:[#allocation2 + $0x200] sm:$0xff] }
  0x2c   :  { %882 = vmatprep.subr.bf16.mxu0 %v881_v14  ;;  %v218_v43 = vld [vmem:[#allocation2 + $0x238] sm:$0xff]  ;;  %v215_v46 = vld [vmem:[#allocation2 + $0x220] sm:$0xff]  ;;  %v891_v47 = vpack.c.bf16 %v209_v40, %v205_v39  ;;  %v220_v48 = vld [vmem:[#allocation2 + $0x248] sm:$0xff] }
  0x2d   :  { %v224_v49 = vld [vmem:[#allocation2 + $0x268] sm:$0xff]  ;;  %v893_v50 = vpack.c.bf16 %v218_v43, %v214_v42  ;;  %v213_v51 = vld [vmem:[#allocation2 + $0x210] sm:$0xff]  ;;  %v831_v53 = vpack.c.bf16 %v215_v46, %v211_v45  ;;  %v222_v54 = vld [vmem:[#allocation2 + $0x258] sm:$0xff] }
  0x2e   :  { %820 = vmatpush1.bf16.msra.mxu1 %v819_v17  ;;  %v217_v52 = vld [vmem:[#allocation2 + $0x230] sm:$0xff]  ;;  %v226_v55 = vld [vmem:[#allocation2 + $0x278] sm:$0xff]  ;;  %v833_v56 = vpack.c.bf16 %v224_v49, %v220_v48  ;;  %v219_v57 = vld [vmem:[#allocation2 + $0x240] sm:$0xff] }
  0x2f   :  { %822 = vmatprep.subr.bf16.mxu1 %v821_v20  ;;  %884 = vmatpush1.bf16.msra.mxu0 %v883_v23  ;;  %v223_v58 = vld [vmem:[#allocation2 + $0x260] sm:$0xff]  ;;  %v895_v59 = vpack.c.bf16 %v217_v52, %v213_v51  ;;  %v228_v60 = vld [vmem:[#allocation2 + $0x288] sm:$0xff]  ;;  %v897_v62 = vpack.c.bf16 %v226_v55, %v222_v54  ;;  %v221_v63 = vld [vmem:[#allocation2 + $0x250] sm:$0xff] }
  0x30   :  { %886 = vmatprep.subr.bf16.mxu0 %v885_v26  ;;  %v232_v61 = vld [vmem:[#allocation2 + $0x2a8] sm:$0xff]  ;;  %v225_v0 = vld [vmem:[#allocation2 + $0x270] sm:$0xff]  ;;  %v835_v1 = vpack.c.bf16 %v223_v58, %v219_v57  ;;  %v230_v2 = vld [vmem:[#allocation2 + $0x298] sm:$0xff] }
  0x31   :  { %v234_v3 = vld [vmem:[#allocation2 + $0x2b8] sm:$0xff]  ;;  %v837_v4 = vpack.c.bf16 %v232_v61, %v228_v60  ;;  %v227_v5 = vld [vmem:[#allocation2 + $0x280] sm:$0xff]  ;;  %v899_v7 = vpack.c.bf16 %v225_v0, %v221_v63  ;;  %v236_v8 = vld [vmem:[#allocation2 + $0x2c8] sm:$0xff] }
  0x32   :  { %824 = vmatpush1.bf16.msra.mxu1 %v823_v29  ;;  %v231_v6 = vld [vmem:[#allocation2 + $0x2a0] sm:$0xff]  ;;  %v240_v9 = vld [vmem:[#allocation2 + $0x2e8] sm:$0xff]  ;;  %v901_v10 = vpack.c.bf16 %v234_v3, %v230_v2  ;;  %v229_v11 = vld [vmem:[#allocation2 + $0x290] sm:$0xff] }
  0x33   :  { %826 = vmatprep.subr.bf16.mxu1 %v825_v32  ;;  %888 = vmatpush1.bf16.msra.mxu0 %v887_v35  ;;  %v233_v12 = vld [vmem:[#allocation2 + $0x2b0] sm:$0xff]  ;;  %v839_v13 = vpack.c.bf16 %v231_v6, %v227_v5  ;;  %v238_v14 = vld [vmem:[#allocation2 + $0x2d8] sm:$0xff]  ;;  %v841_v16 = vpack.c.bf16 %v240_v9, %v236_v8  ;;  %v235_v17 = vld [vmem:[#allocation2 + $0x2c0] sm:$0xff] }
  0x34   :  { %890 = vmatprep.subr.bf16.mxu0 %v889_v38  ;;  %v242_v15 = vld [vmem:[#allocation2 + $0x2f8] sm:$0xff]  ;;  %v239_v18 = vld [vmem:[#allocation2 + $0x2e0] sm:$0xff]  ;;  %v903_v19 = vpack.c.bf16 %v233_v12, %v229_v11  ;;  %v244_v20 = vld [vmem:[#allocation2 + $0x308] sm:$0xff] }
  0x35   :  { %v248_v21 = vld [vmem:[#allocation2 + $0x328] sm:$0xff]  ;;  %v905_v22 = vpack.c.bf16 %v242_v15, %v238_v14  ;;  %v237_v23 = vld [vmem:[#allocation2 + $0x2d0] sm:$0xff]  ;;  %v843_v25 = vpack.c.bf16 %v239_v18, %v235_v17  ;;  %v246_v26 = vld [vmem:[#allocation2 + $0x318] sm:$0xff]  ;;  %v49_v15 = vlaneseq }
  0x36   :  { %828 = vmatpush1.bf16.msra.mxu1 %v827_v41  ;;  %v241_v24 = vld [vmem:[#allocation2 + $0x2f0] sm:$0xff]  ;;  %v250_v27 = vld [vmem:[#allocation2 + $0x338] sm:$0xff]  ;;  %v845_v28 = vpack.c.bf16 %v248_v21, %v244_v20  ;;  %v243_v29 = vld [vmem:[#allocation2 + $0x300] sm:$0xff] }
  0x37   :  { %830 = vmatprep.subr.bf16.mxu1 %v829_v44  ;;  %892 = vmatpush1.bf16.msra.mxu0 %v891_v47  ;;  %v247_v30 = vld [vmem:[#allocation2 + $0x320] sm:$0xff]  ;;  %v907_v31 = vpack.c.bf16 %v241_v24, %v237_v23  ;;  %v252_v32 = vld [vmem:[#allocation2 + $0x348] sm:$0xff]  ;;  %v909_v34 = vpack.c.bf16 %v250_v27, %v246_v26  ;;  %v245_v35 = vld [vmem:[#allocation2 + $0x310] sm:$0xff] }
  0x38   :  { %894 = vmatprep.subr.bf16.mxu0 %v893_v50  ;;  %v256_v33 = vld [vmem:[#allocation2 + $0x368] sm:$0xff]  ;;  %v249_v36 = vld [vmem:[#allocation2 + $0x330] sm:$0xff]  ;;  %v847_v37 = vpack.c.bf16 %v247_v30, %v243_v29  ;;  %v254_v38 = vld [vmem:[#allocation2 + $0x358] sm:$0xff] }
  0x39   :  { %v258_v39 = vld [vmem:[#allocation2 + $0x378] sm:$0xff]  ;;  %v849_v40 = vpack.c.bf16 %v256_v33, %v252_v32  ;;  %v251_v41 = vld [vmem:[#allocation2 + $0x340] sm:$0xff]  ;;  %v911_v43 = vpack.c.bf16 %v249_v36, %v245_v35  ;;  %v260_v44 = vld [vmem:[#allocation2 + $0x388] sm:$0xff] }
  0x3a   :  { %832 = vmatpush1.bf16.msra.mxu1 %v831_v53  ;;  %v255_v42 = vld [vmem:[#allocation2 + $0x360] sm:$0xff]  ;;  %v264_v45 = vld [vmem:[#allocation2 + $0x3a8] sm:$0xff]  ;;  %v913_v46 = vpack.c.bf16 %v258_v39, %v254_v38  ;;  %v253_v47 = vld [vmem:[#allocation2 + $0x350] sm:$0xff] }
  0x3b   :  { %834 = vmatprep.subr.bf16.mxu1 %v833_v56  ;;  %896 = vmatpush1.bf16.msra.mxu0 %v895_v59  ;;  %v257_v48 = vld [vmem:[#allocation2 + $0x370] sm:$0xff]  ;;  %v851_v49 = vpack.c.bf16 %v255_v42, %v251_v41  ;;  %v262_v50 = vld [vmem:[#allocation2 + $0x398] sm:$0xff]  ;;  %v853_v52 = vpack.c.bf16 %v264_v45, %v260_v44  ;;  %v259_v55 = vld [vmem:[#allocation2 + $0x380] sm:$0xff] }
  0x3c   :  { %898 = vmatprep.subr.bf16.mxu0 %v897_v62  ;;  %v266_v51 = vld [vmem:[#allocation2 + $0x3b8] sm:$0xff]  ;;  %v915_v53 = vpack.c.bf16 %v257_v48, %v253_v47  ;;  %v263_v56 = vld [vmem:[#allocation2 + $0x3a0] sm:$0xff]  ;;  %v261_v57 = vld [vmem:[#allocation2 + $0x390] sm:$0xff] }
  0x3d   :  { %v917_v54 = vpack.c.bf16 %v266_v51, %v262_v50  ;;  %v855_v58 = vpack.c.bf16 %v263_v56, %v259_v55  ;;  %v265_v59 = vld [vmem:[#allocation2 + $0x3b0] sm:$0xff]  ;;  %v268_v61 = vld [vmem:[#allocation2 + $0x3c8] sm:$0xff]  ;;  %v270_v63 = vld [vmem:[#allocation2 + $0x3d8] sm:$0xff] }
  0x3e   :  { %836 = vmatpush1.bf16.msra.mxu1 %v835_v1  ;;  %v919_v60 = vpack.c.bf16 %v265_v59, %v261_v57  ;;  %v272_v62 = vld [vmem:[#allocation2 + $0x3e8] sm:$0xff]  ;;  %v274_v1 = vld [vmem:[#allocation2 + $0x3f8] sm:$0xff]  ;;  %v267_v2 = vld [vmem:[#allocation2 + $0x3c0] sm:$0xff] }
  0x3f   :  { %838 = vmatprep.subr.bf16.mxu1 %v837_v4  ;;  %900 = vmatpush1.bf16.msra.mxu0 %v899_v7  ;;  %v857_v0 = vpack.c.bf16 %v272_v62, %v268_v61  ;;  %v271_v3 = vld [vmem:[#allocation2 + $0x3e0] sm:$0xff]  ;;  %v921_v4 = vpack.c.bf16 %v274_v1, %v270_v63  ;;  %v269_v6 = vld [vmem:[#allocation2 + $0x3d0] sm:$0xff]  ;;  %v460_v24 = vld [vmem:[%s1363_s5 + $0x8] sm:$0xff] }
  0x40   :  { %902 = vmatprep.subr.bf16.mxu0 %v901_v10  ;;  %v859_v5 = vpack.c.bf16 %v271_v3, %v267_v2  ;;  %v273_v7 = vld [vmem:[#allocation2 + $0x3f0] sm:$0xff]  ;;  %v475_v9 = vld [vmem:[%s1363_s5 + $0x80] sm:$0xff]  ;;  %v476_v10 = vld [vmem:[%s1363_s5 + $0x88] sm:$0xff] }
  0x41   :  { %v923_v8 = vpack.c.bf16 %v273_v7, %v269_v6  ;;  %v507_v11 = vld [vmem:[%s1363_s5 + $0x180] sm:$0xff]  ;;  %v925_v12 = vpack.c.bf16 %v476_v10, %v475_v9  ;;  %v477_v29 = vld [vmem:[%s1363_s5 + $0x90] sm:$0xff]  ;;  %v510_v33 = vld [vmem:[%s1363_s5 + $0x198] sm:$0xff] }
  0x42   :  { %840 = vmatpush1.bf16.msra.mxu1 %v839_v13  ;;  %v508_v13 = vld [vmem:[%s1363_s5 + $0x188] sm:$0xff]  ;;  %v47_v18 = vld [vmem:[%s1360_s2] sm:$0x3]  ;;  %v509_v32 = vld [vmem:[%s1363_s5 + $0x190] sm:$0xff] }
  0x43   :  { %842 = vmatprep.subr.bf16.mxu1 %v841_v16  ;;  %904 = vmatpush1.bf16.msra.mxu0 %v903_v19  ;;  %v957_v14 = vpack.c.bf16 %v508_v13, %v507_v11  ;;  %v1143_v16 = vshrl.u32 %v49_v15, 7  ;;  %v459_v23 = vld [vmem:[%s1363_s5] sm:$0xff]  ;;  %v461_v38 = vld [vmem:[%s1363_s5 + $0x10] sm:$0xff]  ;;  %v462_v39 = vld [vmem:[%s1363_s5 + $0x18] sm:$0xff]  ;;  %v961_v44 = vpack.c.bf16 %v510_v33, %v509_v32 }
  0x44   :  { %906 = vmatprep.subr.bf16.mxu0 %v905_v22  ;;  %v491_v27 = vld [vmem:[%s1363_s5 + $0x100] sm:$0xff]  ;;  %v927_v36 = vpack.c.bf16 %v460_v24, %v459_v23  ;;  %v493_v45 = vld [vmem:[%s1363_s5 + $0x110] sm:$0xff]  ;;  %v512_v51 = vld [vmem:[%s1363_s5 + $0x1a8] sm:$0xff] }
  0x45   :  { %v51_v17 = vsub.s32 0, %v1143_v16  ;;  %v55_v19 = vsub.s32 1, %v1143_v16  ;;  %v479_v47 = vld [vmem:[%s1363_s5 + $0xa0] sm:$0xff]  ;;  %v464_v56 = vld [vmem:[%s1363_s5 + $0x28] sm:$0xff]  ;;  %v481_v62 = vld [vmem:[%s1363_s5 + $0xb0] sm:$0xff] }
  0x46   :  { %844 = vmatpush1.bf16.msra.mxu1 %v843_v25  ;;  %v511_v50 = vld [vmem:[%s1363_s5 + $0x1a0] sm:$0xff]  ;;  %v496_v61 = vld [vmem:[%s1363_s5 + $0x128] sm:$0xff]  ;;  %v482_v63 = vld [vmem:[%s1363_s5 + $0xb8] sm:$0xff] }
  0x47   :  { %846 = vmatprep.subr.bf16.mxu1 %v845_v28  ;;  %908 = vmatpush1.bf16.msra.mxu0 %v907_v31  ;;  %v52_v20 = vrot.slane %v47_v18, %v51_v17  ;;  %v56_v21 = vrot.slane %v47_v18, %v55_v19  ;;  %v492_v28 = vld [vmem:[%s1363_s5 + $0x108] sm:$0xff]  ;;  %v478_v31 = vld [vmem:[%s1363_s5 + $0x98] sm:$0xff]  ;;  %v463_v55 = vld [vmem:[%s1363_s5 + $0x20] sm:$0xff]  ;;  %v965_v59 = vpack.c.bf16 %v512_v51, %v511_v50 }
  0x48   :  { %910 = vmatprep.subr.bf16.mxu0 %v909_v34  ;;  %v514_v1 = vld [vmem:[%s1363_s5 + $0x1b8] sm:$0xff]  ;;  %v935_v2 = vpack.c.bf16 %v464_v56, %v463_v55  ;;  %v937_v6 = vpack.c.bf16 %v482_v63, %v481_v62  ;;  %v483_v10 = vld [vmem:[%s1363_s5 + $0xc0] sm:$0xff]  ;;  %v484_v11 = vld [vmem:[%s1363_s5 + $0xc8] sm:$0xff]  ;;  %v287_v63 = vsub.s32 2, %v1143_v16 }
  0x49   :  { %v498_v9 = vld [vmem:[%s1363_s5 + $0x138] sm:$0xff]  ;;  %v516_v13 = vld [vmem:[%s1363_s5 + $0x1c8] sm:$0xff]  ;;  %v467_v18 = vld [vmem:[%s1363_s5 + $0x40] sm:$0xff] }
  0x4a   :  { %848 = vmatpush1.bf16.msra.mxu1 %v847_v37  ;;  %v959_v37 = vpack.c.bf16 %v492_v28, %v491_v27  ;;  %v499_v23 = vld [vmem:[%s1363_s5 + $0x140] sm:$0xff]  ;;  %v500_v24 = vld [vmem:[%s1363_s5 + $0x148] sm:$0xff]  ;;  %v517_v27 = vld [vmem:[%s1363_s5 + $0x1d0] sm:$0xff] }
  0x4b   :  { %850 = vmatprep.subr.bf16.mxu1 %v849_v40  ;;  %912 = vmatpush1.bf16.msra.mxu0 %v911_v43  ;;  %v929_v43 = vpack.c.bf16 %v478_v31, %v477_v29  ;;  %v518_v28 = vld [vmem:[%s1363_s5 + $0x1d8] sm:$0xff]  ;;  %v469_v31 = vld [vmem:[%s1363_s5 + $0x50] sm:$0xff] }
  0x4c   :  { %914 = vmatprep.subr.bf16.mxu0 %v913_v46  ;;  %v494_v46 = vld [vmem:[%s1363_s5 + $0x118] sm:$0xff]  ;;  %v489_v51 = vld [vmem:[%s1363_s5 + $0xf0] sm:$0xff] }
  0x4d   :  { %v470_v32 = vld [vmem:[%s1363_s5 + $0x58] sm:$0xff]  ;;  %v473_v56 = vld [vmem:[%s1363_s5 + $0x70] sm:$0xff] }
  0x4e   :  { %852 = vmatpush1.bf16.msra.mxu1 %v851_v49  ;;  %v480_v49 = vld [vmem:[%s1363_s5 + $0xa8] sm:$0xff]  ;;  %v522_v55 = vld [vmem:[%s1363_s5 + $0x1f8] sm:$0xff] }
  0x4f   :  { %854 = vmatprep.subr.bf16.mxu1 %v853_v52  ;;  %916 = vmatpush1.bf16.msra.mxu0 %v915_v53  ;;  %v931_v53 = vpack.c.bf16 %v462_v39, %v461_v38  ;;  %v488_v38 = vld [vmem:[%s1363_s5 + $0xe8] sm:$0xff]  ;;  %v519_v39 = vld [vmem:[%s1363_s5 + $0x1e0] sm:$0xff] }
  0x50   :  { %918 = vmatprep.subr.bf16.mxu0 %v917_v54  ;;  %v963_v54 = vpack.c.bf16 %v494_v46, %v493_v45  ;;  %v471_v45 = vld [vmem:[%s1363_s5 + $0x60] sm:$0xff]  ;;  %v472_v46 = vld [vmem:[%s1363_s5 + $0x68] sm:$0xff] }
  0x52   :  { %856 = vmatpush1.bf16.msra.mxu1 %v855_v58  ;;  %v933_v58 = vpack.c.bf16 %v480_v49, %v479_v47  ;;  %v503_v47 = vld [vmem:[%s1363_s5 + $0x160] sm:$0xff]  ;;  %v504_v49 = vld [vmem:[%s1363_s5 + $0x168] sm:$0xff] }
  0x53   :  { %920 = vmatpush1.bf16.msra.mxu0 %v919_v60  ;;  %858 = vmatprep.subr.bf16.mxu1 %v857_v0  ;;  %v495_v60 = vld [vmem:[%s1363_s5 + $0x120] sm:$0xff]  ;;  %v513_v0 = vld [vmem:[%s1363_s5 + $0x1b0] sm:$0xff]  ;;  %v983_v50 = vpack.c.bf16 %v504_v49, %v503_v47 }
  0x54   :  { %922 = vmatprep.subr.bf16.mxu0 %v921_v4  ;;  %v967_v3 = vpack.c.bf16 %v496_v61, %v495_v60  ;;  %v465_v4 = vld [vmem:[%s1363_s5 + $0x30] sm:$0xff]  ;;  %v969_v7 = vpack.c.bf16 %v514_v1, %v513_v0  ;;  %v506_v61 = vld [vmem:[%s1363_s5 + $0x178] sm:$0xff]  ;;  %v275_v0 = vld [vmem:[%s1362_s4] sm:$0xf]  ;;  %v291_v1 = vsub.s32 3, %v1143_v16 }
  0x55   :  { %v505_v60 = vld [vmem:[%s1363_s5 + $0x170] sm:$0xff] }
  0x56   :  { %860 = vmatpush1.bf16.msra.mxu1 %v859_v5  ;;  %v466_v5 = vld [vmem:[%s1363_s5 + $0x38] sm:$0xff]  ;;  %v987_v62 = vpack.c.bf16 %v506_v61, %v505_v60 }
  0x57   :  { %924 = vmatpush1.bf16.msra.mxu0 %v923_v8  ;;  %926 = vmatprep.subr.bf16.mxu1 %v925_v12  ;;  %v497_v8 = vld [vmem:[%s1363_s5 + $0x130] sm:$0xff]  ;;  %v515_v12 = vld [vmem:[%s1363_s5 + $0x1c0] sm:$0xff] }
  0x58   :  { %958 = vmatprep.subr.bf16.mxu0 %v957_v14  ;;  %v939_v14 = vpack.c.bf16 %v466_v5, %v465_v4  ;;  %v971_v15 = vpack.c.bf16 %v498_v9, %v497_v8  ;;  %v284_v4 = vrot.slane %v275_v0, %v55_v19  ;;  %v292_v5 = vrot.slane %v275_v0, %v291_v1 }
  0xed   :  { %v132_v22 = vpop.f32.mrb[0].mxu0 }
  0xee   :  { %v133_v25 = vadd.f32 %v132_v22, %v52_v20  ;;  %v134_v26 = vpop.f32.mrb[1].mxu0  ;;  %v973_v22 = vpack.c.bf16 %v516_v13, %v515_v12 }
  0xef   :  { %v135_v30 = vadd.f32 %v134_v26, %v56_v21  ;;  %v486_v26 = vld [vmem:[%s1363_s5 + $0xd8] sm:$0xff] }
  0xf0   :  { %v143_v40 = vmax.f32 %v133_v25, 0.0  ;;  %v485_v25 = vld [vmem:[%s1363_s5 + $0xd0] sm:$0xff] }
  0xf1   :  { %v144_v34 = vmax.f32 %v135_v30, 0.0  ;;  %v138_v35 = vpop.f32.mrb[2].mxu0  ;;  %v975_v30 = vpack.c.bf16 %v500_v24, %v499_v23  ;;  %v945_v33 = vpack.c.bf16 %v486_v26, %v485_v25 }
  0xf2   :  { %v139_v41 = vadd.f32 %v138_v35, %v52_v20  ;;  %v140_v42 = vpop.f32.mrb[3].mxu0  ;;  %v468_v20 = vld [vmem:[%s1363_s5 + $0x48] sm:$0xff]  ;;  %v501_v35 = vld [vmem:[%s1363_s5 + $0x150] sm:$0xff] }
  0xf3   :  { %v141_v48 = vadd.f32 %v140_v42, %v56_v21  ;;  %361 = vmatprep.mubr.f32.mxu1 %v144_v34  ;;  %438 = vmatprep.mubr.f32.mxu0 %v144_v34  ;;  %v941_v21 = vpack.c.bf16 %v484_v11, %v483_v10  ;;  %v943_v29 = vpack.c.bf16 %v468_v20, %v467_v18 }
  0xf4   :  { %362 = vmatmul.mubr.f32.vlgmr.msra.gmra.mrb[0].mxu1 %v143_v40  ;;  %439 = vmatmul.mubr.f32.vlgmr.msra.gmra.mrb[4].mxu0 %v143_v40  ;;  %v145_v57 = vmax.f32 %v139_v41, 0.0  ;;  %v977_v34 = vpack.c.bf16 %v518_v28, %v517_v27  ;;  %v520_v40 = vld [vmem:[%s1363_s5 + $0x1e8] sm:$0xff]  ;;  %v947_v41 = vpack.c.bf16 %v470_v32, %v469_v31  ;;  %v714_v32 = vld [vmem:[%s1364_s6] ss:$0 sm:$0xff]  ;;  %s1056_s6 = smov [#allocation5]  }
  0xf5   :  { %v146_v52 = vmax.f32 %v141_v48, 0.0  ;;  %928 = vmatpush3.bf16.msra.mxu1 %v927_v36  ;;  %960 = vmatpush3.bf16.msra.mxu0 %v959_v37  ;;  %v502_v36 = vld [vmem:[%s1363_s5 + $0x158] sm:$0xff]  ;;  %v487_v37 = vld [vmem:[%s1363_s5 + $0xe0] sm:$0xff]  ;;  %v951_v48 = vpack.c.bf16 %v472_v46, %v471_v45  ;;  %s700_s23 = sshll.u32 %s1056_s6, 4  ;;  %s701_s23 = int_to_ptr.vmem [resolvable:$true] %s700_s23 }
  0xf6   :  { %930 = vmatprep.subr.bf16.mxu1 %v929_v43  ;;  %962 = vmatprep.subr.bf16.mxu0 %v961_v44  ;;  %v979_v42 = vpack.c.bf16 %v502_v36, %v501_v35  ;;  %v949_v43 = vpack.c.bf16 %v488_v38, %v487_v37  ;;  %v981_v44 = vpack.c.bf16 %v520_v40, %v519_v39  ;;  %s1026_s1 = scalar_lea.vmem %s701_s23, 256  ;;  %p1031_p9 = scmp.lt.s32.totalorder %s701_s23, %s701_s23 }
  0xf7   :  { %367 = vmatprep.mubr.f32.mxu1 %v146_v52  ;;  %444 = vmatprep.mubr.f32.mxu0 %v146_v52  ;;  %v490_v52 = vld [vmem:[%s1363_s5 + $0xf8] sm:$0xff]  ;;  %p1027_p8 = scmp.ne.s32.totalorder %s701_s23, %s1026_s1  ;;  %p1032_p10 = scmp.lt.s32.totalorder %s1026_s1, %s1026_s1 }
  0xf8   :  { %368 = vmatmul.mubr.f32.gmra.mrb[2].mxu1 %v145_v57  ;;  %445 = vmatmul.mubr.f32.gmra.mrb[6].mxu0 %v145_v57  ;;  %v474_v57 = vld [vmem:[%s1363_s5 + $0x78] sm:$0xff] }
  0xf9   :  { %932 = vmatpush3.bf16.msra.mxu1 %v931_v53  ;;  %964 = vmatpush3.bf16.msra.mxu0 %v963_v54  ;;  %v521_v53 = vld [vmem:[%s1363_s5 + $0x1f0] sm:$0xff]  ;;  %v953_v54 = vpack.c.bf16 %v490_v52, %v489_v51  ;;  %p1033_p11 = por %p1032_p10, %p1031_p9 }
  0xfa   :  { %934 = vmatprep.subr.bf16.mxu1 %v933_v58  ;;  %966 = vmatprep.subr.bf16.mxu0 %v965_v59  ;;  %v985_v58 = vpack.c.bf16 %v522_v55, %v521_v53  ;;  %v955_v59 = vpack.c.bf16 %v474_v57, %v473_v56 }
  0xfb   :  { %p1034_p12 = pnand %p1033_p11, %p1027_p8 }
  0xfd   :  { %936 = vmatpush3.bf16.msra.mxu1 %v935_v2  ;;  %968 = vmatpush3.bf16.msra.mxu0 %v967_v3  ;;  %v280_v2 = vrot.slane %v275_v0, %v51_v17  ;;  %v288_v3 = vrot.slane %v275_v0, %v287_v63 }
  0xfe   :  { %938 = vmatprep.subr.bf16.mxu1 %v937_v6  ;;  %970 = vmatprep.subr.bf16.mxu0 %v969_v7 }
 0x101   :  { %940 = vmatpush3.bf16.msra.mxu1 %v939_v14  ;;  %972 = vmatpush3.bf16.msra.mxu0 %v971_v15 }
 0x102   :  { %942 = vmatprep.subr.bf16.mxu1 %v941_v21  ;;  %974 = vmatprep.subr.bf16.mxu0 %v973_v22 }
 0x105   :  { %944 = vmatpush3.bf16.msra.mxu1 %v943_v29  ;;  %976 = vmatpush3.bf16.msra.mxu0 %v975_v30 }
 0x106   :  { %946 = vmatprep.subr.bf16.mxu1 %v945_v33  ;;  %978 = vmatprep.subr.bf16.mxu0 %v977_v34 }
 0x109   :  { %948 = vmatpush3.bf16.msra.mxu1 %v947_v41  ;;  %980 = vmatpush3.bf16.msra.mxu0 %v979_v42 }
 0x10a   :  { %950 = vmatprep.subr.bf16.mxu1 %v949_v43  ;;  %982 = vmatprep.subr.bf16.mxu0 %v981_v44 }
 0x10d   :  { %952 = vmatpush3.bf16.msra.mxu1 %v951_v48  ;;  %984 = vmatpush3.bf16.msra.mxu0 %v983_v50 }
 0x10e   :  { %954 = vmatprep.subr.bf16.mxu1 %v953_v54  ;;  %986 = vmatprep.subr.bf16.mxu0 %v985_v58 }
 0x111   :  { %956 = vmatpush3.bf16.msra.mxu1 %v955_v59  ;;  %988 = vmatpush3.bf16.msra.mxu0 %v987_v62 }
 0x1c7   :  { %v363_v6 = vpop.f32.mrb[0].mxu1  ;;  %v440_v7 = vpop.f32.mrb[4].mxu0 }
 0x1c8   :  { %v364_v8 = vadd.f32 %v363_v6, %v280_v2  ;;  %v441_v9 = vadd.f32 %v440_v7, %v288_v3  ;;  %v365_v10 = vpop.f32.mrb[1].mxu1  ;;  %v442_v11 = vpop.f32.mrb[5].mxu0 }
 0x1c9   :  { %v366_v12 = vadd.f32 %v365_v10, %v284_v4  ;;  %v443_v13 = vadd.f32 %v442_v11, %v292_v5 }
 0x1ca   :  { %v451_v21 = vmax.f32 %v364_v8, 0.0  ;;  %v453_v22 = vmax.f32 %v441_v9, 0.0 }
 0x1cb   :  { %v452_v14 = vmax.f32 %v366_v12, 0.0  ;;  %v454_v15 = vmax.f32 %v443_v13, 0.0  ;;  %v369_v18 = vpop.f32.mrb[2].mxu1  ;;  %v446_v20 = vpop.f32.mrb[6].mxu0 }
 0x1cc   :  { %v370_v17 = vadd.f32 %v369_v18, %v280_v2  ;;  %v447_v23 = vadd.f32 %v446_v20, %v288_v3  ;;  %v371_v24 = vpop.f32.mrb[3].mxu1  ;;  %v448_v16 = vpop.f32.mrb[7].mxu0 }
 0x1cd   :  { %v372_v19 = vadd.f32 %v371_v24, %v284_v4  ;;  %v449_v25 = vadd.f32 %v448_v16, %v292_v5  ;;  %594 = vmatprep.mubr.f32.mxu1 %v452_v14  ;;  %669 = vmatprep.mubr.f32.mxu0 %v454_v15 }
 0x1ce   :  { %595 = vmatmul.mubr.f32.vlgmr.msra.gmra.mrb[4].mxu1 %v451_v21  ;;  %670 = vmatmul.mubr.f32.vlgmr.msra.gmra.mrb[8].mxu0 %v453_v22  ;;  %v455_v28 = vmax.f32 %v370_v17, 0.0  ;;  %v457_v29 = vmax.f32 %v447_v23, 0.0 }
 0x1cf   :  { %v456_v26 = vmax.f32 %v372_v19, 0.0  ;;  %v458_v27 = vmax.f32 %v449_v25, 0.0 }
 0x1d1   :  { %599 = vmatprep.mubr.f32.mxu1 %v456_v26  ;;  %674 = vmatprep.mubr.f32.mxu0 %v458_v27 }
 0x1d2   :  { %600 = vmatmul.mubr.f32.gmra.mrb[6].mxu1 %v455_v28  ;;  %675 = vmatmul.mubr.f32.gmra.mrb[10].mxu0 %v457_v29 }
 0x2a1   :  { %v749_v30 = vpop.f32.mrb[4].mxu1  ;;  %v787_v31 = vpop.f32.mrb[8].mxu0 }
 0x2a2   :  { %v750_v33 = vpop.f32.mrb[5].mxu1  ;;  %v788_v34 = vpop.f32.mrb[9].mxu0 }
 0x2a3   :  { %v751_v35 = vadd.f32 %v750_v33, %v749_v30  ;;  %v789_v36 = vadd.f32 %v788_v34, %v787_v31 }
 0x2a5   :  { %v597_v37 = vadd.f32 %v751_v35, %v714_v32  ;;  %v752_v38 = vpop.f32.mrb[6].mxu1  ;;  %v790_v39 = vpop.f32.mrb[10].mxu0 }
 0x2a6   :  { %v753_v40 = vpop.f32.mrb[7].mxu1  ;;  %v791_v41 = vpop.f32.mrb[11].mxu0 }
 0x2a7   :  { %v672_v42 = vadd.f32 %v789_v36, %v597_v37  ;;  %v754_v43 = vadd.f32 %v753_v40, %v752_v38  ;;  %v792_v44 = vadd.f32 %v791_v41, %v790_v39 }
 0x2a9   :  { %v715_v45 = vmul.f32 -1.442695, %v672_v42  ;;  %v602_v46 = vadd.f32 %v754_v43, %v714_v32 }
 0x2ab   :  { %996 = vpow2.f32 %v715_v45  ;;  %v677_v47 = vadd.f32 %v792_v44, %v602_v46 }
 0x2ad   :  { %v716_v48 = vmul.f32 -1.442695, %v677_v47 }
 0x2af   :  { %998 = vpow2.f32 %v716_v48 }
 0x2b5   :  { %v997_v49 = vpop.eup %996 }
 0x2b6   :  { %v686_v50 = vadd.f32 1.0, %v997_v49 }
 0x2b8   :  { %1000 = vrcp.f32 %v686_v50 }
 0x2b9   :  { %v999_v51 = vpop.eup %998 }
 0x2ba   :  { %v687_v52 = vadd.f32 1.0, %v999_v51 }
 0x2bc   :  { %1002 = vrcp.f32 %v687_v52 }
 0x2c2   :  { %v1001_v53 = vpop.eup %1000 }
 0x2c3   :  { %693 = vst.msk [vmem:[#allocation5] sm:$0xff] %vm692_vm1, %v1001_v53 }
 0x2c6   :  { %v1003_v54 = vpop.eup %1002 }
 0x2c7   :  { %694 = vst.msk [vmem:[#allocation5 + $0x8] sm:$0xff] %vm692_vm1, %v1003_v54 }
 0x2c8   :  { %1037 = shalt.err (!%p1034_p12)
}
 0x2c9   :  { %s1038_s25 = scalar_lea.hbm %s1365_s7, 256 }
 0x2ca   :  { %p1039_p13 = scmp.ne.s32.totalorder %s1365_s7, %s1038_s25  ;;  %p1042_p0 = scmp.lt.u32.totalorder %s1038_s25, %s1365_s7 }
 0x2cc   :  { %p1044_p1 = pnand %p1042_p0, %p1039_p13 }
 0x2ce   :  { %1047 = shalt.err (!%p1044_p1)
}
 0x2cf   :  { %s1057_s30 = smov 128   ;;  %s1058_s8 = smov 8  }
 0x2d0   :  { %706 = dma.vmem_to_hbm [thread:$0]  %s701_s23, 256, %s1365_s7, [#allocation4], %s1057_s30, %s1057_s30, %s1058_s8  }
 0x2d1   :  { %1050 = dma.done.wait [#allocation4], 256  }
 0x2d2   :  { %1051 = vsyncadd [#allocation4], 4294967040 }
 0x2d3   :  { %710 = vsyncpa [#allocation3], 1 }
 0x2d4   :  { %711 = vsyncpa [#allocation4], 1 }

</bundles_post_ra>
